<compile_context>
chip_gen: v7x
topology: tpu7x:2x2x1
jax: 0.10.0
libtpu: 0.0.40
codegen_flags: <defaults>
</compile_context>

<pallas_src>
import functools

import jax
import jax.numpy as jnp
from jax.experimental import pallas as pl
from jax.experimental.pallas import tpu as pltpu

NEG_SLOPE = 0.01   # LeakyReLU negative_slope
BN_EPS = 1e-5      # nn.BatchNorm2d default eps

_CP = pltpu.CompilerParams(vmem_limit_bytes=32 * 1024 * 1024)


# --------------------------- kernel epilogues ---------------------------------

def _bn_groups(acc, g_col, beta_col, phases, c_out):
    """Training-mode BatchNorm2d over `phases` stacked row-groups of c_out
    channels.  Statistics are reduced over all M lanes of all groups in a
    single pass (sum & sum-of-squares).  Correct because every layer is a
    single grid step over the full M extent."""
    inv = 1.0 / float(phases * acc.shape[1])
    groups = [acc[ph * c_out:(ph + 1) * c_out, :] for ph in range(phases)]
    s = groups[0].sum(axis=1, keepdims=True)
    ss = (groups[0] * groups[0]).sum(axis=1, keepdims=True)
    for grp in groups[1:]:
        s = s + grp.sum(axis=1, keepdims=True)
        ss = ss + (grp * grp).sum(axis=1, keepdims=True)
    mean = s * inv
    var = jnp.maximum(ss * inv - mean * mean, 0.0)
    scale = jax.lax.rsqrt(var + BN_EPS) * g_col
    shift = beta_col - mean * scale
    return [grp * scale + shift for grp in groups]


def _mm_bias_kernel(w_ref, x_ref, b_ref, o_ref, *, act):
    """(R,K)@(K,M) + bias (+ LeakyReLU)."""
    acc = jnp.dot(w_ref[...], x_ref[...],
                  preferred_element_type=jnp.float32) + b_ref[...]
    if act:
        acc = jnp.maximum(acc, NEG_SLOPE * acc)
    o_ref[...] = acc.astype(o_ref.dtype)


def _mm_bias_bn_kernel(w_ref, x_ref, b_ref, g_ref, beta_ref, o_ref,
                       *, act, phases, c_out):
    """(R,K)@(K,M) + bias (+ LeakyReLU) + fused training-mode BatchNorm2d.

    Output rows are `phases` stacked groups of c_out channels (phases=1 for
    ordinary convs, 4 for sub-pixel deconvs); BN statistics are reduced over
    the M lanes of every row-group belonging to a channel."""
    acc = jnp.dot(w_ref[...], x_ref[...],
                  preferred_element_type=jnp.float32) + b_ref[...]
    if act:
        acc = jnp.maximum(acc, NEG_SLOPE * acc)
    for ph, blk in enumerate(_bn_groups(acc, g_ref[...], beta_ref[...],
                                        phases, c_out)):
        o_ref[ph * c_out:(ph + 1) * c_out, :] = blk.astype(o_ref.dtype)


def _bottleneck_kernel(x5_ref, w5_ref, b5_ref, we_ref, be_ref, wd_ref, bd_ref,
                       wt5_ref, bt5_ref, g_ref, beta_ref, z_ref, o_ref,
                       *, c_out):
    """Fused bottleneck: conv5 + relu5_1 + embedding + deembedding + relu5_2 +
    deconv5 + relu4_2 + bn4_2 — four chained MXU matmuls in one pallas_call."""
    # conv5 (3x3 stride-2 on a 3x3 input -> 1x1 output) + relu5_1
    a = jnp.dot(w5_ref[...], x5_ref[...],
                preferred_element_type=jnp.float32) + b5_ref[...]
    a = jnp.maximum(a, NEG_SLOPE * a)
    # embedding -> z
    z = jnp.dot(we_ref[...], a.astype(jnp.bfloat16),
                preferred_element_type=jnp.float32) + be_ref[...]
    z_ref[...] = z
    # deembedding + relu5_2
    d = jnp.dot(wd_ref[...], z.astype(jnp.bfloat16),
                preferred_element_type=jnp.float32) + bd_ref[...]
    d = jnp.maximum(d, NEG_SLOPE * d)
    # deconv5 (1x1 -> 3x3; rows ordered (tap, c_out)) + relu4_2 + bn4_2
    t = jnp.dot(wt5_ref[...], d.astype(jnp.bfloat16),
                preferred_element_type=jnp.float32) + bt5_ref[...]
    t = jnp.maximum(t, NEG_SLOPE * t)
    for ph, blk in enumerate(_bn_groups(t, g_ref[...], beta_ref[...],
                                        9, c_out)):
        o_ref[ph * c_out:(ph + 1) * c_out, :] = blk.astype(o_ref.dtype)


# ------------------------- layer wrappers (forward) ----------------------------

def _cols_t(x_cm, k, stride, pad):
    """x_cm: (C, N, H, W) bf16 -> transposed im2col (k*k*C, N*OH*OW)."""
    c, n, h, w = x_cm.shape
    oh = (h + 2 * pad - k) // stride + 1
    ow = (w + 2 * pad - k) // stride + 1
    xp = jnp.pad(x_cm, ((0, 0), (0, 0), (pad, pad), (pad, pad))) if pad else x_cm
    slabs = [xp[:, :, di:di + stride * oh:stride, dj:dj + stride * ow:stride]
             for di in range(k) for dj in range(k)]
    cols = jnp.stack(slabs, axis=0)                     # (k*k, C, N, OH, OW)
    return cols.reshape(k * k * c, n * oh * ow), oh, ow


def conv2d_cm(x_cm, prm, *, k, stride, pad, act=True, bn=True,
              out_dtype=jnp.bfloat16):
    """PyTorch Conv2d (+LeakyReLU +BatchNorm2d) on channel-major (C,N,H,W) bf16."""
    c_out = prm["w"].shape[0]
    n = x_cm.shape[1]
    cols, oh, ow = _cols_t(x_cm, k, stride, pad)
    if bn:
        kernel = functools.partial(_mm_bias_bn_kernel, act=act, phases=1,
                                   c_out=c_out)
        args = (prm["w"], cols, prm["b"], prm["g"], prm["beta"])
    else:
        kernel = functools.partial(_mm_bias_kernel, act=act)
        args = (prm["w"], cols, prm["b"])
    out = pl.pallas_call(
        kernel,
        out_shape=jax.ShapeDtypeStruct((c_out, n * oh * ow), out_dtype),
        compiler_params=_CP)(*args)
    return out.reshape(c_out, n, oh, ow)


def deconv_subpixel_cm(x_cm, prm, *, act=True, bn=True,
                       out_dtype=jnp.bfloat16):
    """PyTorch ConvTranspose2d(k=5, s=2, p=2, op=1) (+LeakyReLU +BatchNorm2d)
    via 4-phase sub-pixel decomposition: one matmul over a shared 3x3 stride-1
    im2col, pixel-shuffle afterwards.  BN stats combine the 4 phase groups."""
    c_out = prm["w"].shape[0] // 4
    _, n, h, w = x_cm.shape
    cols, _, _ = _cols_t(x_cm, 3, 1, 1)
    if bn:
        kernel = functools.partial(_mm_bias_bn_kernel, act=act, phases=4,
                                   c_out=c_out)
        args = (prm["w"], cols, prm["b"], prm["g"], prm["beta"])
    else:
        kernel = functools.partial(_mm_bias_kernel, act=act)
        args = (prm["w"], cols, prm["b"])
    out = pl.pallas_call(
        kernel,
        out_shape=jax.ShapeDtypeStruct((4 * c_out, n * h * w), out_dtype),
        compiler_params=_CP)(*args)
    out = out.reshape(2, 2, c_out, n, h, w).transpose(2, 3, 4, 0, 5, 1)
    return out.reshape(c_out, n, 2 * h, 2 * w)


def bottleneck_cm(h4_cm, pp):
    """Fused conv5/embedding/deembedding/deconv5 block.

    h4_cm: (64, N, 3, 3) bf16 (conv4 output).
    Returns z_t (EMBEDDING_DIM, N) f32 and (64, N, 3, 3) bf16 (bn4_2 output)."""
    c, n = h4_cm.shape[0], h4_cm.shape[1]
    x5 = h4_cm.reshape(c, n, 9).transpose(2, 0, 1).reshape(9 * c, n)
    c5_out = FILTERS[3]
    z, t = pl.pallas_call(
        functools.partial(_bottleneck_kernel, c_out=c5_out),
        out_shape=(jax.ShapeDtypeStruct((EMBEDDING_DIM, n), jnp.float32),
                   jax.ShapeDtypeStruct((9 * c5_out, n), jnp.bfloat16)),
        compiler_params=_CP,
    )(x5, pp["w5"], pp["b5"], pp["we"], pp["be"], pp["wd"], pp["bd"],
      pp["wt5"], pp["bt5"], pp["g4_2"], pp["beta4_2"])
    h = t.reshape(3, 3, c5_out, n).transpose(2, 3, 0, 1)       # (64, N, 3, 3)
    return z, h


# ----------------------------- CAE_BN_5 config ---------------------------------

INPUT_SHAPE = [48, 48, 1]          # [H, W, C] (PyTorch module convention)
EMBEDDING_DIM = 30
FILTERS = [32, 32, 64, 64, 128]

_cs1 = (INPUT_SHAPE[0] + 1) // 2
_cs2 = (_cs1 + 1) // 2
_cs3 = (_cs2 + 1) // 2
_cs4 = (_cs3 + 1) // 2
_cs5 = (_cs4 - 1) // 2
CONV_SIZES = [_cs1, _cs2, _cs3, _cs4, _cs5]
LIN_FEATURES = CONV_SIZES[-1] * CONV_SIZES[-1] * FILTERS[-1]

OUT_PAD5 = CONV_SIZES[3] - (CONV_SIZES[4] - 1) * 2 + 2 * 0 - 3
OUT_PAD4 = CONV_SIZES[2] - (CONV_SIZES[3] - 1) * 2 + 2 * 2 - 5
OUT_PAD3 = CONV_SIZES[1] - (CONV_SIZES[2] - 1) * 2 + 2 * 2 - 5
OUT_PAD2 = CONV_SIZES[0] - (CONV_SIZES[1] - 1) * 2 + 2 * 2 - 5
OUT_PAD1 = INPUT_SHAPE[0] - (CONV_SIZES[0] - 1) * 2 + 2 * 2 - 5


# ------------------------ parameter init / preparation -------------------------

def init_params(key):
    """Raw parameters in PyTorch layouts."""
    def nrm(key, shape, scale=0.05):
        return scale * jax.random.normal(key, shape, dtype=jnp.float32)

    keys = jax.random.split(key, 32)
    ki = iter(keys)
    p = {}
    p["conv1_w"] = nrm(next(ki), (FILTERS[0], INPUT_SHAPE[2], 5, 5))
    p["conv1_b"] = nrm(next(ki), (FILTERS[0],))
    p["conv2_w"] = nrm(next(ki), (FILTERS[1], FILTERS[0], 5, 5))
    p["conv2_b"] = nrm(next(ki), (FILTERS[1],))
    p["conv3_w"] = nrm(next(ki), (FILTERS[2], FILTERS[1], 5, 5))
    p["conv3_b"] = nrm(next(ki), (FILTERS[2],))
    p["conv4_w"] = nrm(next(ki), (FILTERS[3], FILTERS[2], 5, 5))
    p["conv4_b"] = nrm(next(ki), (FILTERS[3],))
    p["conv5_w"] = nrm(next(ki), (FILTERS[4], FILTERS[3], 3, 3))
    p["conv5_b"] = nrm(next(ki), (FILTERS[4],))
    p["emb_w"] = nrm(next(ki), (EMBEDDING_DIM, LIN_FEATURES))
    p["emb_b"] = nrm(next(ki), (EMBEDDING_DIM,))
    p["deemb_w"] = nrm(next(ki), (LIN_FEATURES, EMBEDDING_DIM))
    p["deemb_b"] = nrm(next(ki), (LIN_FEATURES,))
    # ConvTranspose2d weight layout: (Cin, Cout, k, k)
    p["deconv5_w"] = nrm(next(ki), (FILTERS[4], FILTERS[3], 3, 3))
    p["deconv5_b"] = nrm(next(ki), (FILTERS[3],))
    p["deconv4_w"] = nrm(next(ki), (FILTERS[3], FILTERS[2], 5, 5))
    p["deconv4_b"] = nrm(next(ki), (FILTERS[2],))
    p["deconv3_w"] = nrm(next(ki), (FILTERS[2], FILTERS[1], 5, 5))
    p["deconv3_b"] = nrm(next(ki), (FILTERS[1],))
    p["deconv2_w"] = nrm(next(ki), (FILTERS[1], FILTERS[0], 5, 5))
    p["deconv2_b"] = nrm(next(ki), (FILTERS[0],))
    p["deconv1_w"] = nrm(next(ki), (FILTERS[0], INPUT_SHAPE[2], 5, 5))
    p["deconv1_b"] = nrm(next(ki), (INPUT_SHAPE[2],))
    for name, c in [("bn1_1", FILTERS[0]), ("bn2_1", FILTERS[1]),
                    ("bn3_1", FILTERS[2]), ("bn4_1", FILTERS[3]),
                    ("bn4_2", FILTERS[3]), ("bn3_2", FILTERS[2]),
                    ("bn2_2", FILTERS[1]), ("bn1_2", FILTERS[0])]:
        p[name + "_g"] = jnp.ones((c,), jnp.float32)
        p[name + "_b"] = jnp.zeros((c,), jnp.float32)
    return p


def _col(v):
    return jnp.asarray(v, jnp.float32).reshape(-1, 1)


def _conv_w_mat(w):
    """Conv2d weight (Cout,Cin,k,k) -> bf16 matmul form (Cout, k*k*Cin)."""
    co, ci, k, _ = w.shape
    return w.transpose(0, 2, 3, 1).reshape(co, k * k * ci).astype(jnp.bfloat16)


def _deconv_subpixel_w_mat(w_t):
    """ConvTranspose2d (Cin,Cout,5,5) -> 4-phase 3x3 weights (4*Cout, 9*Cin) bf16."""
    ci, co, k, _ = w_t.shape
    assert k == 5
    w_pad = jnp.pad(w_t, ((0, 0), (0, 0), (0, 1), (0, 1)))     # 5 -> 6 (zeros)
    phase_w = []
    for rh in range(2):
        for rw in range(2):
            wp = jnp.flip(w_pad[:, :, rh::2, rw::2], axis=(2, 3))
            phase_w.append(wp.transpose(1, 0, 2, 3))           # (Cout,Cin,3,3)
    w_all = jnp.concatenate(phase_w, axis=0)                   # (4*Cout,Cin,3,3)
    return w_all.transpose(0, 2, 3, 1).reshape(4 * co, 9 * ci).astype(jnp.bfloat16)


def prepare_params(p):
    """One-time conversion of PyTorch-layout params into kernel-ready arrays:
    bf16 matmul-form weights, 4-phase deconv decomposition, (R,1) f32
    bias/gamma/beta columns.  Runs ONCE, outside the jitted forward."""
    assert CONV_SIZES[4] == 1 and OUT_PAD5 == 0, \
        "fused bottleneck assumes a 1x1 conv5 output"
    assert OUT_PAD4 == OUT_PAD3 == OUT_PAD2 == OUT_PAD1 == 1, \
        "sub-pixel deconv path assumes output_padding=1"
    pp = {}
    for name, bn in [("conv1", "bn1_1"), ("conv2", "bn2_1"),
                     ("conv3", "bn3_1"), ("conv4", "bn4_1")]:
        pp[name] = dict(w=_conv_w_mat(p[name + "_w"]), b=_col(p[name + "_b"]),
                        g=_col(p[bn + "_g"]), beta=_col(p[bn + "_b"]))
    # fused bottleneck: conv5 + embedding + deembedding + deconv5 (+ bn4_2)
    pp["w5"] = _conv_w_mat(p["conv5_w"])                       # (128, 9*64)
    pp["b5"] = _col(p["conv5_b"])
    pp["we"] = p["emb_w"].astype(jnp.bfloat16)                 # (30, 128)
    pp["be"] = _col(p["emb_b"])
    pp["wd"] = p["deemb_w"].astype(jnp.bfloat16)               # (128, 30)
    pp["bd"] = _col(p["deemb_b"])
    pp["wt5"] = (p["deconv5_w"].transpose(2, 3, 1, 0)
                 .reshape(9 * FILTERS[3], FILTERS[4]).astype(jnp.bfloat16))
    pp["bt5"] = jnp.tile(_col(p["deconv5_b"]), (9, 1))
    pp["g4_2"] = _col(p["bn4_2_g"])
    pp["beta4_2"] = _col(p["bn4_2_b"])
    # sub-pixel decoder deconvs
    for name, bn in [("deconv4", "bn3_2"), ("deconv3", "bn2_2"),
                     ("deconv2", "bn1_2"), ("deconv1", None)]:
        d = dict(w=_deconv_subpixel_w_mat(p[name + "_w"]),
                 b=jnp.tile(_col(p[name + "_b"]), (4, 1)))
        if bn is not None:
            d["g"] = _col(p[bn + "_g"])
            d["beta"] = _col(p[bn + "_b"])
        pp[name] = d
    return pp


# --------------------------------- forward -------------------------------------

def cae_bn_5_forward(x, pp):
    """x: (N, 1, 48, 48) float32, pp: prepared params.
    Returns (z (N, 30) f32, x_reconstructed (N, 1, 48, 48) f32)."""
    n = x.shape[0]
    h = x.astype(jnp.bfloat16).transpose(1, 0, 2, 3)              # (1, N, H, W)
    # encoder: conv + LeakyReLU + BatchNorm fused per pallas_call
    h = conv2d_cm(h, pp["conv1"], k=5, stride=2, pad=2)
    h = conv2d_cm(h, pp["conv2"], k=5, stride=2, pad=2)
    h = conv2d_cm(h, pp["conv3"], k=5, stride=2, pad=2)
    h = conv2d_cm(h, pp["conv4"], k=5, stride=2, pad=2)           # (64, N, 3, 3)
    # fused bottleneck (single pallas_call):
    # conv5 + relu5_1 + embedding + deembedding + relu5_2 + deconv5 + relu4_2 + bn4_2
    z_t, h = bottleneck_cm(h, pp)                                 # (30,N), (64,N,3,3)
    # decoder: sub-pixel ConvTranspose2d + LeakyReLU + BatchNorm fused per call
    h = deconv_subpixel_cm(h, pp["deconv4"])
    h = deconv_subpixel_cm(h, pp["deconv3"])
    h = deconv_subpixel_cm(h, pp["deconv2"])
    h = deconv_subpixel_cm(h, pp["deconv1"], act=False, bn=False,
                           out_dtype=jnp.float32)                 # no tanh/relu
    x_rec = h.transpose(1, 0, 2, 3)                               # (N, 1, H, W)
    return z_t.T, x_rec


# --------------------------------- self-checks ----------------------------------

def _conv_ref(x, w, b, stride, pad):
    y = jax.lax.conv_general_dilated(
        x, w, (stride, stride), [(pad, pad), (pad, pad)],
        dimension_numbers=("NCHW", "OIHW", "NCHW"))
    return y + b.reshape(1, -1, 1, 1)


def _deconv_ref(x, w_t, b, stride, pad, out_pad):
    k = w_t.shape[2]
    w_c = jnp.flip(w_t, axis=(2, 3)).transpose(1, 0, 2, 3)
    lo = k - 1 - pad
    y = jax.lax.conv_general_dilated(
        x, w_c, (1, 1), [(lo, lo + out_pad), (lo, lo + out_pad)],
        lhs_dilation=(stride, stride),
        dimension_numbers=("NCHW", "OIHW", "NCHW"))
    return y + b.reshape(1, -1, 1, 1)


def _leaky_bn_ref(y, g, bt):
    y = jnp.where(y >= 0, y, NEG_SLOPE * y)
    mean = y.mean(axis=(0, 2, 3), keepdims=True)
    var = ((y - mean) ** 2).mean(axis=(0, 2, 3), keepdims=True)
    return ((y - mean) * jax.lax.rsqrt(var + BN_EPS) * g.reshape(1, -1, 1, 1)
            + bt.reshape(1, -1, 1, 1))


def _bottleneck_ref(x4, p):
    y = _conv_ref(x4, p["conv5_w"], p["conv5_b"], 2, 0)
    y = jnp.where(y >= 0, y, NEG_SLOPE * y)
    y = y.reshape(y.shape[0], -1)
    z = y @ p["emb_w"].T + p["emb_b"]
    d = z @ p["deemb_w"].T + p["deemb_b"]
    d = jnp.where(d >= 0, d, NEG_SLOPE * d)
    d = d.reshape(d.shape[0], FILTERS[4], 1, 1)
    t = _deconv_ref(d, p["deconv5_w"], p["deconv5_b"], 2, 0, OUT_PAD5)
    t = _leaky_bn_ref(t, p["bn4_2_g"], p["bn4_2_b"])
    return z, t


def _assert_close(got, want, name, tol=0.05):
    err = float(jnp.max(jnp.abs(got.astype(jnp.float32) - want)))
    scale = float(jnp.max(jnp.abs(want))) + 1e-3
    assert err <= tol * scale, f"{name}: max|err|={err:.4g} scale={scale:.4g}"


def _self_check(key):
    ks = jax.random.split(key, 8)
    x = jax.random.normal(ks[0], (2, 4, 12, 12), jnp.float32)
    w = 0.1 * jax.random.normal(ks[1], (8, 4, 5, 5), jnp.float32)
    b = 0.1 * jax.random.normal(ks[2], (8,), jnp.float32)
    g = 1.0 + 0.1 * jax.random.normal(ks[3], (8,), jnp.float32)
    bt = 0.1 * jax.random.normal(ks[4], (8,), jnp.float32)
    x_cm = x.transpose(1, 0, 2, 3).astype(jnp.bfloat16)
    # 1. Conv2d (k5,s2,p2) + LeakyReLU + BN (phases=1) vs XLA reference.
    prm = dict(w=_conv_w_mat(w), b=_col(b), g=_col(g), beta=_col(bt))
    got = conv2d_cm(x_cm, prm, k=5, stride=2, pad=2, act=True, bn=True,
                    out_dtype=jnp.float32).transpose(1, 0, 2, 3)
    _assert_close(got, _leaky_bn_ref(_conv_ref(x, w, b, 2, 2), g, bt), "conv_bn")
    # 1b. Plain conv epilogue (no act, no bn).
    prm2 = dict(w=_conv_w_mat(w), b=_col(b))
    got = conv2d_cm(x_cm, prm2, k=5, stride=2, pad=2, act=False, bn=False,
                    out_dtype=jnp.float32).transpose(1, 0, 2, 3)
    _assert_close(got, _conv_ref(x, w, b, 2, 2), "conv_plain")
    # 2. ConvTranspose2d sub-pixel path (k5,s2,p2,op1) + LeakyReLU + BN.
    wt = 0.1 * jax.random.normal(ks[5], (4, 8, 5, 5), jnp.float32)
    prm3 = dict(w=_deconv_subpixel_w_mat(wt), b=jnp.tile(_col(b), (4, 1)),
                g=_col(g), beta=_col(bt))
    got = deconv_subpixel_cm(x_cm, prm3, act=True, bn=True,
                             out_dtype=jnp.float32).transpose(1, 0, 2, 3)
    want = _leaky_bn_ref(_deconv_ref(x, wt, b, 2, 2, 1), g, bt)
    _assert_close(got, want, "deconv_subpixel_bn")
    # 3. Fused bottleneck vs reference chain (real model dims).
    p = init_params(ks[6])
    pp = prepare_params(p)
    x4 = jax.random.normal(ks[7], (2, FILTERS[3], 3, 3), jnp.float32)
    z_got_t, h_got = bottleneck_cm(x4.transpose(1, 0, 2, 3).astype(jnp.bfloat16), pp)
    z_want, t_want = _bottleneck_ref(x4, p)
    _assert_close(z_got_t.T, z_want, "bottleneck_z")
    _assert_close(h_got.astype(jnp.float32).transpose(1, 0, 2, 3), t_want,
                  "bottleneck_deconv5", tol=0.1)


# ----------------------------------- main ---------------------------------------

if __name__ == "__main__":
    key = jax.random.PRNGKey(0)
    pkey, xkey, ckey = jax.random.split(key, 3)

    _self_check(ckey)

    params = init_params(pkey)
    pp = prepare_params(params)    # one-time weight prep, outside the jitted forward
    batch = 2
    x_in = jax.random.normal(
        xkey, (batch, INPUT_SHAPE[2], INPUT_SHAPE[0], INPUT_SHAPE[1]),
        dtype=jnp.float32)

    fwd = jax.jit(cae_bn_5_forward)
    z, x_rec = fwd(x_in, pp)
    jax.block_until_ready((z, x_rec))

    assert z.shape == (batch, EMBEDDING_DIM), z.shape
    assert x_rec.shape == (batch, INPUT_SHAPE[2], INPUT_SHAPE[0],
                           INPUT_SHAPE[1]), x_rec.shape
    assert bool(jnp.all(jnp.isfinite(z))) and bool(jnp.all(jnp.isfinite(x_rec)))
    print("KERNEL_OK")
</pallas_src>

<mosaic_0001>
module attributes {stable_mosaic.version = 11 : i64} {
  func.func @_mm_bias_bn_kernel(%arg0: memref<8x100xbf16, #tpu.memory_space<vmem>>, %arg1: memref<100x72xbf16, #tpu.memory_space<vmem>>, %arg2: memref<8x1xf32, #tpu.memory_space<vmem>>, %arg3: memref<8x1xf32, #tpu.memory_space<vmem>>, %arg4: memref<8x1xf32, #tpu.memory_space<vmem>>, %arg5: memref<8x72xf32, #tpu.memory_space<vmem>>) attributes {dimension_semantics = [], scalar_prefetch = 0 : i64, scratch_operands = 0 : i64, tpu.core_type = #tpu.core_type<tc>} {
    %c0 = arith.constant 0 : index
    %c0_0 = arith.constant 0 : index
    %0 = vector.load %arg0[%c0, %c0_0] : memref<8x100xbf16, #tpu.memory_space<vmem>>, vector<8x100xbf16>
    %c0_1 = arith.constant 0 : index
    %c0_2 = arith.constant 0 : index
    %1 = vector.load %arg1[%c0_1, %c0_2] : memref<100x72xbf16, #tpu.memory_space<vmem>>, vector<100x72xbf16>
    %cst = arith.constant dense<0.000000e+00> : vector<8x72xf32>
    %2 = tpu.matmul %0, %1, %cst {dimension_numbers = #tpu.dot_dimension_numbers<[1], [0], [0], [1], [0, 0, 1, 1], [], []>} : vector<8x100xbf16>, vector<100x72xbf16>, vector<8x72xf32> -> vector<8x72xf32>
    %c0_3 = arith.constant 0 : index
    %c0_4 = arith.constant 0 : index
    %3 = vector.load %arg2[%c0_3, %c0_4] : memref<8x1xf32, #tpu.memory_space<vmem>>, vector<8x1xf32>
    %4 = vector.broadcast %3 : vector<8x1xf32> to vector<8x72xf32>
    %5 = arith.addf %2, %4 : vector<8x72xf32>
    %cst_5 = arith.constant 0.00999999977 : f32
    %6 = vector.broadcast %cst_5 : f32 to vector<8x72xf32>
    %7 = arith.mulf %6, %5 : vector<8x72xf32>
    %8 = arith.maximumf %5, %7 : vector<8x72xf32>
    %c0_6 = arith.constant 0 : index
    %c0_7 = arith.constant 0 : index
    %9 = vector.load %arg3[%c0_6, %c0_7] : memref<8x1xf32, #tpu.memory_space<vmem>>, vector<8x1xf32>
    %c0_8 = arith.constant 0 : index
    %c0_9 = arith.constant 0 : index
    %10 = vector.load %arg4[%c0_8, %c0_9] : memref<8x1xf32, #tpu.memory_space<vmem>>, vector<8x1xf32>
    %cst_10 = arith.constant dense<0.000000e+00> : vector<8xf32>
    %11 = vector.multi_reduction <add>, %8, %cst_10 [1] : vector<8x72xf32> to vector<8xf32>
    %12 = vector.shape_cast %11 : vector<8xf32> to vector<8x1xf32>
    %13 = arith.mulf %8, %8 : vector<8x72xf32>
    %cst_11 = arith.constant dense<0.000000e+00> : vector<8xf32>
    %14 = vector.multi_reduction <add>, %13, %cst_11 [1] : vector<8x72xf32> to vector<8xf32>
    %15 = vector.shape_cast %14 : vector<8xf32> to vector<8x1xf32>
    %cst_12 = arith.constant 0.013888889 : f32
    %16 = vector.broadcast %cst_12 : f32 to vector<8x1xf32>
    %17 = arith.mulf %12, %16 : vector<8x1xf32>
    %cst_13 = arith.constant 0.013888889 : f32
    %18 = vector.broadcast %cst_13 : f32 to vector<8x1xf32>
    %19 = arith.mulf %15, %18 : vector<8x1xf32>
    %20 = arith.mulf %17, %17 : vector<8x1xf32>
    %21 = arith.subf %19, %20 : vector<8x1xf32>
    %cst_14 = arith.constant 0.000000e+00 : f32
    %22 = vector.broadcast %cst_14 : f32 to vector<8x1xf32>
    %23 = arith.maximumf %21, %22 : vector<8x1xf32>
    %cst_15 = arith.constant 9.99999974E-6 : f32
    %24 = vector.broadcast %cst_15 : f32 to vector<8x1xf32>
    %25 = arith.addf %23, %24 : vector<8x1xf32>
    %26 = math.rsqrt %25 : vector<8x1xf32>
    %27 = arith.mulf %26, %9 : vector<8x1xf32>
    %28 = arith.mulf %17, %27 : vector<8x1xf32>
    %29 = arith.subf %10, %28 : vector<8x1xf32>
    %30 = vector.broadcast %27 : vector<8x1xf32> to vector<8x72xf32>
    %31 = arith.mulf %8, %30 : vector<8x72xf32>
    %32 = vector.broadcast %29 : vector<8x1xf32> to vector<8x72xf32>
    %33 = arith.addf %31, %32 : vector<8x72xf32>
    %c0_16 = arith.constant 0 : index
    %c0_17 = arith.constant 0 : index
    %34 = vector.load %arg5[%c0_16, %c0_17] : memref<8x72xf32, #tpu.memory_space<vmem>>, vector<8x72xf32>
    tpu.vector_store %arg5[%c0_16, %c0_17], %33 {strides = array<i32>} : memref<8x72xf32, #tpu.memory_space<vmem>>, vector<8x72xf32>,
    return
  }
}

</mosaic_0001>

<bundles_post_ra>
// kernel: tpu_custom_call.1
= control target key start
LH: loop header
LB: loop body
LE: loop exit
PB: predicated region body
PF: predicated region fallthrough
CT: control target
= control target key end

     0   :  { %v251_v1 = vmov 0.0   ;;  %vm252_vm0 = vmmov 0   ;;  %v253_v3 = vmov 0   ;;  %s333_s0 = inlined_call_operand.vmem [shape: bf16[8,100], index: 0, kind: input, shape index: {}]   ;;  %s334_s1 = inlined_call_operand.vmem [shape: bf16[100,72], index: 1, kind: input, shape index: {}]   ;;  %s335_s2 = inlined_call_operand.vmem [shape: f32[8,1], index: 2, kind: input, shape index: {}]   ;;  %s336_s3 = inlined_call_operand.vmem [shape: f32[8,1], index: 3, kind: input, shape index: {}]   ;;  %s337_s4 = inlined_call_operand.vmem [shape: f32[8,1], index: 4, kind: input, shape index: {}]   ;;  %s338_s5 = inlined_call_operand.hbm [shape: f32[8,72], index: 5, kind: output, shape index: {}]  }
   0x1   :  { %v218_v0 = vld [vmem:[%s334_s1] sm:$0xff]   ;;  %194 = vmatprep.subr.bf16.mxu0 %v251_v1  ;;  %v219_v2 = vld [vmem:[%s334_s1 + $0x8] sm:$0xff]   ;;  %208 = vmatprep.mubr.msk.bf16.mxu0 %vm252_vm0, %v251_v1  ;;  %v220_v4 = vld [vmem:[%s334_s1 + $0x10] sm:$0xff]  }
   0x2   :  { %195 = vmatpush3.bf16.msra.mxu0 %v218_v0  ;;  %216 = vset.pattern.permute.xlu0 %v253_v3  ;;  %v36_v5 = vld [vmem:[%s335_s2] sm:$0xff] }
   0x3   :  { %196 = vmatprep.subr.bf16.mxu0 %v251_v1  ;;  %217 = vset.pattern.permute.xlu1 %v253_v3 }
   0x4   :  { %39 = vperm.xlu0 %216, %v36_v5  }
   0x6   :  { %197 = vmatpush3.bf16.msra.mxu0 %v219_v2 }
   0x7   :  { %198 = vmatprep.subr.bf16.mxu0 %v251_v1 }
   0x8   :  { %10 = vsyncpa [#allocation3], 0  ;;  %v221_v6 = vld [vmem:[%s334_s1 + $0x18] sm:$0xff]   ;;  %v222_v7 = vld [vmem:[%s334_s1 + $0x20] sm:$0xff]   ;;  %vm85_vm1 = vcmask 1041408   ;;  %vm81_vm2 = vcmask 818176  }
   0x9   :  { %v223_v8 = vld [vmem:[%s334_s1 + $0x28] sm:$0xff]   ;;  %v224_v9 = vld [vmem:[%s334_s1 + $0x30] ss:$0 sps:$4 sm:$0x33]   ;;  %v22_v11 = vld [vmem:[%s333_s0] sm:$0xf] }
   0xa   :  { %199 = vmatpush3.bf16.msra.mxu0 %v220_v4  ;;  %v87_v10 = vsel %vm85_vm1, %v224_v9, 0  ;;  %vm133_vm3 = vcmask 588800   ;;  %v131_v31 = vld [vmem:[%s336_s3] sm:$0xff]  ;;  %s254_s12 = smov [#allocation2]  }
   0xb   :  { %200 = vmatprep.subr.bf16.mxu0 %v251_v1  ;;  %v132_v34 = vld [vmem:[%s337_s4] sm:$0xff]  ;;  %s170_s13 = sshll.u32 %s254_s12, 4  ;;  %s171_s13 = int_to_ptr.vmem [resolvable:$true] %s170_s13 }
   0xc   :  { %s227_s3 = scalar_lea.vmem %s171_s13, 128  ;;  %p232_p1 = scmp.lt.s32.totalorder %s171_s13, %s171_s13 }
   0xd   :  { %p228_p0 = scmp.ne.s32.totalorder %s171_s13, %s227_s3  ;;  %p233_p2 = scmp.lt.s32.totalorder %s227_s3, %s227_s3 }
   0xe   :  { %201 = vmatpush3.bf16.msra.mxu0 %v221_v6 }
   0xf   :  { %202 = vmatprep.subr.bf16.mxu0 %v251_v1  ;;  %p234_p3 = por %p233_p2, %p232_p1 }
  0x11   :  { %p235_p4 = pnand %p234_p3, %p228_p0 }
  0x12   :  { %203 = vmatpush3.bf16.msra.mxu0 %v222_v7 }
  0x13   :  { %204 = vmatprep.subr.bf16.mxu0 %v251_v1 }
  0x16   :  { %205 = vmatpush3.bf16.msra.mxu0 %v223_v8 }
  0x17   :  { %206 = vmatprep.subr.bf16.mxu0 %v251_v1 }
  0x1a   :  { %207 = vmatpush3.bf16.msra.mxu0 %v87_v10 }
  0x1d   :  { %209 = vmatmul.mubr.msk.bf16.vlgmr.msra.gmra.mrb[0].mxu0 %vm81_vm2, %v22_v11 }
  0x83   :  { %v40_v12 = vpop.permute.xlu0 %39 }
  0xf0   :  { %v123_v13 = vpop.f32.mrb[0].mxu0 }
  0xf1   :  { %v124_v14 = vadd.f32 %v123_v13, %v40_v12  ;;  %v210_v15 = vpop.f32.mrb[1].mxu0 }
  0xf2   :  { %v126_v16 = vpop.f32.mrb[2].mxu0 }
  0xf3   :  { %v129_v17 = vmul.f32 0.01, %v124_v14  ;;  %v211_v18 = vpop.f32.mrb[3].mxu0 }
  0xf5   :  { %v130_v19 = vmax.f32 %v124_v14, %v129_v17 }
  0xf7   :  { %v134_v20 = vsel %vm133_vm3, %v130_v19, 0.0  ;;  %v137_v21 = vmul.f32 %v130_v19, %v130_v19 }
  0xf8   :  { %135 = vadd.xlane.f32.xlu0 %v134_v20 }
  0xf9   :  { %v138_v22 = vsel %vm133_vm3, %v137_v21, 0.0 }
  0xfa   :  { %139 = vadd.xlane.f32.xlu1 %v138_v22 }
 0x185   :  { %v136_v23 = vpop.xlane.xlu0 %135 }
 0x186   :  { %v141_v24 = vmul.f32 0.013888889, %v136_v23 }
 0x187   :  { %v140_v25 = vpop.xlane.xlu1 %139 }
 0x188   :  { %v143_v26 = vmul.f32 %v141_v24, %v141_v24  ;;  %v142_v27 = vmul.f32 0.013888889, %v140_v25 }
 0x18a   :  { %v144_v28 = vsub.f32 %v142_v27, %v143_v26 }
 0x18c   :  { %v145_v29 = vmax.f32 %v144_v28, 0.0 }
 0x18e   :  { %v146_v30 = vadd.f32 1e-05, %v145_v29 }
 0x190   :  { %225 = vrsqrt.f32 %v146_v30 }
 0x19a   :  { %v226_v32 = vpop.eup %225 }
 0x19b   :  { %v148_v33 = vmul.f32 %v226_v32, %v131_v31 }
 0x19d   :  { %153 = vperm.xlu1 %217, %v148_v33   ;;  %v149_v35 = vmul.f32 %v148_v33, %v141_v24 }
 0x19f   :  { %v150_v36 = vsub.f32 %v132_v34, %v149_v35 }
 0x1a1   :  { %159 = vperm.xlu1 %217, %v150_v36  }
 0x21c   :  { %v154_v37 = vpop.permute.xlu1 %153 }
 0x21d   :  { %v156_v38 = vmul.f32 %v154_v37, %v130_v19 }
 0x220   :  { %v160_v39 = vpop.permute.xlu1 %159 }
 0x221   :  { %v162_v40 = vadd.f32 %v160_v39, %v156_v38 }
 0x223   :  { %163 = vst.msk [vmem:[#allocation2] sm:$0xff] %vm133_vm3, %v162_v40 }
 0x224   :  { %238 = shalt.err (!%p235_p4)
}
 0x225   :  { %s239_s15 = scalar_lea.hbm %s338_s5, 128 }
 0x226   :  { %p240_p5 = scmp.ne.s32.totalorder %s338_s5, %s239_s15  ;;  %p243_p6 = scmp.lt.u32.totalorder %s239_s15, %s338_s5 }
 0x228   :  { %p245_p7 = pnand %p243_p6, %p240_p5 }
 0x22a   :  { %248 = shalt.err (!%p245_p7)
}
 0x22b   :  { %173 = dma.vmem_to_hbm [thread:$0]  %s171_s13, 128, %s338_s5, [#allocation3]  }
 0x22c   :  { %249 = dma.done.wait [#allocation3], 128  }
 0x22d   :  { %250 = vsyncadd [#allocation3], 4294967168 }
 0x22e   :  { %177 = vsyncpa [#allocation3], 1 }

</bundles_post_ra>
